<compile_context>
chip_gen: v5e
topology: v5e:2x2
jax: 0.10.0
libtpu: 0.0.40
codegen_flags: <defaults>
</compile_context>

<pallas_src>
import jax
import jax.numpy as jnp
from jax.experimental import pallas as pl
from jax.experimental.pallas import tpu as pltpu


# ---------------------------------------------------------------------------
# Kernel: fused 4x (Linear + ReLU) on one row-tile of the flattened input.
# ---------------------------------------------------------------------------
def _fc_mlp_kernel(x_ref,
                   w1_ref, b1_ref,
                   w2_ref, b2_ref,
                   w3_ref, b3_ref,
                   w4_ref, b4_ref,
                   o_ref):
    layers = ((w1_ref, b1_ref), (w2_ref, b2_ref),
              (w3_ref, b3_ref), (w4_ref, b4_ref))
    h = x_ref[...]                                   # bf16 row tile
    for idx, (w_ref, b_ref) in enumerate(layers):
        # bf16 x bf16 operands, f32 accumulation on the MXU.
        h = jnp.dot(h, w_ref[...], preferred_element_type=jnp.float32)
        h = jnp.maximum(h + b_ref[...], 0.0)         # f32 bias + ReLU epilogue
        if idx + 1 < len(layers):
            h = h.astype(jnp.bfloat16)               # bf16 operand for next MXU pass
    o_ref[...] = h.astype(o_ref.dtype)


# ---------------------------------------------------------------------------
# Wrapper helpers.
# ---------------------------------------------------------------------------
def _round_up(n, m):
    return ((n + m - 1) // m) * m


def _pad2d(a, shape):
    pads = [(0, t - s) for s, t in zip(a.shape, shape)]
    if any(p[1] for p in pads):
        a = jnp.pad(a, pads)
    return a


def _num_tensorcores():
    """TensorCores per chip (v7x / v4-class megacore chips expose 2)."""
    try:
        kind = jax.devices()[0].device_kind.lower()
    except Exception:   # defensive: never let a query break the forward pass
        return 1
    return 2 if ("v7" in kind or "v4" in kind) else 1


def _pick_row_tile(n_rows, bytes_per_row, num_tensorcores,
                   vmem_budget=12 * 1024 * 1024):
    """Largest (8,128)-friendly row tile (<= 1024) within the VMEM budget,
    shrunk on multi-TC chips until the parallel row grid has >= 1 step/core."""
    if n_rows <= 8:
        return n_rows                                 # tiny batch: full-extent block
    cap = max(8, (vmem_budget // max(bytes_per_row, 1)) // 8 * 8)
    tm = min(1024, cap, (n_rows // 8) * 8)
    while (num_tensorcores > 1 and tm > 8
           and pl.cdiv(n_rows, tm) < num_tensorcores):
        tm = max(8, (tm // 2) // 8 * 8)
    return tm


# ---------------------------------------------------------------------------
# Forward wrapper.
# ---------------------------------------------------------------------------
def observe_embedding_fc_forward(x, params):
    """ObserveEmbeddingFC.forward: flatten + 4x (Linear + ReLU).

    params: list of 4 (w, b) pairs, w: (d_in, d_out), b: (1, d_out).
    """
    (w1, b1), (w2, b2), (w3, b3), (w4, b4) = params
    input_dim = w1.shape[0]
    output_dim = w4.shape[1]
    out_dtype = x.dtype

    if x.ndim > 2:                                    # x.view(-1, input_dim)
        x = x.reshape(-1, input_dim)
    n_rows = x.shape[0]

    # --- parameter preprocessing (once, outside the grid) -------------------
    # Zero-pad hidden widths up to a multiple of 128 (lane-dense activations);
    # exactly forward-preserving.  Cast MXU operands to bf16, keep biases f32.
    ws = [w1, w2, w3, w4]
    bs = [jnp.reshape(b, (1, -1)) for b in (b1, b2, b3, b4)]
    out_dims = [w.shape[1] for w in ws]
    pad_out = [_round_up(d, 128) for d in out_dims[:-1]] + [out_dims[-1]]
    pad_in = [input_dim] + pad_out[:-1]
    ws = [_pad2d(w, (pi, po)).astype(jnp.bfloat16)
          for w, pi, po in zip(ws, pad_in, pad_out)]
    bs = [_pad2d(b, (1, po)).astype(jnp.float32)
          for b, po in zip(bs, pad_out)]
    x_bf16 = x.astype(jnp.bfloat16)                   # halves HBM input bytes

    # --- row tiling ----------------------------------------------------------
    # Double-buffered input (bf16) + output (f32) bytes per row.
    bytes_per_row = 2 * (input_dim * 2 + output_dim * 4)
    tm = _pick_row_tile(n_rows, bytes_per_row, _num_tensorcores())
    grid = (pl.cdiv(n_rows, tm),)                     # ragged last block masked

    row_map = lambda i: (i, 0)                        # tiled over flattened rows
    whole_map = lambda i: (0, 0)                      # params resident across grid

    param_specs = []
    param_args = []
    for w, b in zip(ws, bs):
        param_specs.append(pl.BlockSpec(w.shape, whole_map))
        param_specs.append(pl.BlockSpec(b.shape, whole_map))
        param_args.extend((w, b))

    return pl.pallas_call(
        _fc_mlp_kernel,
        out_shape=jax.ShapeDtypeStruct((n_rows, output_dim), out_dtype),
        grid_spec=pltpu.PrefetchScalarGridSpec(
            num_scalar_prefetch=0,
            grid=grid,
            in_specs=[pl.BlockSpec((tm, input_dim), row_map)] + param_specs,
            out_specs=pl.BlockSpec((tm, output_dim), row_map),
        ),
        compiler_params=pltpu.CompilerParams(
            # Row axis is pure data-parallel (no reduction axis in the grid);
            # megacore-shardable on multi-TensorCore chips.
            dimension_semantics=("parallel",),
        ),
    )(x_bf16, *param_args)


if __name__ == "__main__":
    key = jax.random.PRNGKey(0)

    # Small NCHW observation: batch=2, channels=4, spatial=16x16.
    B, C, H, W = 2, 4, 16, 16
    input_dim = C * H * W       # 1024
    output_dim = 256            # hidden widths 32/64/128 (32/64 padded to 128)

    kx, k1, k2, k3, k4 = jax.random.split(key, 5)
    x = jax.random.normal(kx, (B, C, H, W), dtype=jnp.float32)

    dims = [input_dim, output_dim // 8, output_dim // 4,
            output_dim // 2, output_dim]
    params = []
    for lk, d_in, d_out in zip((k1, k2, k3, k4), dims[:-1], dims[1:]):
        kw, kb = jax.random.split(lk)
        scale = 1.0 / jnp.sqrt(jnp.float32(d_in))
        w = jax.random.normal(kw, (d_in, d_out), dtype=jnp.float32) * scale
        b = jax.random.normal(kb, (1, d_out), dtype=jnp.float32) * scale
        params.append((w, b))

    def reference(xx):
        h = xx.reshape(-1, input_dim) if xx.ndim > 2 else xx
        for w, b in params:
            h = jnp.maximum(h @ w + b, 0.0)
        return h

    # 1) Small NCHW batch (full-extent row block path).
    y = jax.block_until_ready(observe_embedding_fc_forward(x, params))
    assert y.shape == (B, output_dim) and y.dtype == x.dtype
    # bf16 MXU operands (f32 accumulation) vs the pure-f32 reference.
    assert bool(jnp.allclose(y, reference(x), atol=3e-2, rtol=3e-2)), \
        "forward mismatch (batch=2)"

    # 2) Non-divisible flat batch exercising the cdiv grid + ragged last block.
    x2 = jax.random.normal(jax.random.PRNGKey(1), (20, input_dim),
                           dtype=jnp.float32)
    y2 = jax.block_until_ready(observe_embedding_fc_forward(x2, params))
    assert y2.shape == (20, output_dim) and y2.dtype == x2.dtype
    assert bool(jnp.allclose(y2, reference(x2), atol=3e-2, rtol=3e-2)), \
        "forward mismatch (batch=20)"

    print("KERNEL_OK")
</pallas_src>

<mosaic_0001>
module attributes {stable_mosaic.version = 11 : i64} {
  func.func @_fc_mlp_kernel(%arg0: i32, %arg1: memref<2x1024xbf16, #tpu.memory_space<vmem>>, %arg2: memref<1024x128xbf16, #tpu.memory_space<vmem>>, %arg3: memref<1x128xf32, #tpu.memory_space<vmem>>, %arg4: memref<128x128xbf16, #tpu.memory_space<vmem>>, %arg5: memref<1x128xf32, #tpu.memory_space<vmem>>, %arg6: memref<128x128xbf16, #tpu.memory_space<vmem>>, %arg7: memref<1x128xf32, #tpu.memory_space<vmem>>, %arg8: memref<128x256xbf16, #tpu.memory_space<vmem>>, %arg9: memref<1x256xf32, #tpu.memory_space<vmem>>, %arg10: memref<2x256xf32, #tpu.memory_space<vmem>>) attributes {dimension_semantics = [#tpu.dimension_semantics<parallel>], iteration_bounds = array<i64: 1>, scalar_prefetch = 0 : i64, scratch_operands = 0 : i64, tpu.core_type = #tpu.core_type<tc>, window_params = [{transform_indices = @transform_0, window_bounds = array<i64: 2, 1024>}, {pipeline_mode = #tpu.pipeline_mode<synchronous>, transform_indices = @transform_1, window_bounds = array<i64: 1024, 128>}, {pipeline_mode = #tpu.pipeline_mode<synchronous>, transform_indices = @transform_2, window_bounds = array<i64: 1, 128>}, {pipeline_mode = #tpu.pipeline_mode<synchronous>, transform_indices = @transform_3, window_bounds = array<i64: 128, 128>}, {pipeline_mode = #tpu.pipeline_mode<synchronous>, transform_indices = @transform_4, window_bounds = array<i64: 1, 128>}, {pipeline_mode = #tpu.pipeline_mode<synchronous>, transform_indices = @transform_5, window_bounds = array<i64: 128, 128>}, {pipeline_mode = #tpu.pipeline_mode<synchronous>, transform_indices = @transform_6, window_bounds = array<i64: 1, 128>}, {pipeline_mode = #tpu.pipeline_mode<synchronous>, transform_indices = @transform_7, window_bounds = array<i64: 128, 256>}, {pipeline_mode = #tpu.pipeline_mode<synchronous>, transform_indices = @transform_8, window_bounds = array<i64: 1, 256>}, {transform_indices = @transform_9, window_bounds = array<i64: 2, 256>}]} {
    %c0 = arith.constant 0 : index
    %c0_0 = arith.constant 0 : index
    %0 = vector.load %arg1[%c0, %c0_0] : memref<2x1024xbf16, #tpu.memory_space<vmem>>, vector<2x1024xbf16>
    %c0_1 = arith.constant 0 : index
    %c0_2 = arith.constant 0 : index
    %1 = vector.load %arg2[%c0_1, %c0_2] : memref<1024x128xbf16, #tpu.memory_space<vmem>>, vector<1024x128xbf16>
    %cst = arith.constant dense<0.000000e+00> : vector<2x128xf32>
    %2 = tpu.matmul %0, %1, %cst {dimension_numbers = #tpu.dot_dimension_numbers<[1], [0], [0], [1], [0, 0, 1, 1], [], []>} : vector<2x1024xbf16>, vector<1024x128xbf16>, vector<2x128xf32> -> vector<2x128xf32>
    %c0_3 = arith.constant 0 : index
    %c0_4 = arith.constant 0 : index
    %3 = vector.load %arg3[%c0_3, %c0_4] : memref<1x128xf32, #tpu.memory_space<vmem>>, vector<1x128xf32>
    %4 = vector.broadcast %3 : vector<1x128xf32> to vector<2x128xf32>
    %5 = arith.addf %2, %4 : vector<2x128xf32>
    %cst_5 = arith.constant 0.000000e+00 : f32
    %6 = vector.broadcast %cst_5 : f32 to vector<2x128xf32>
    %7 = arith.maximumf %5, %6 : vector<2x128xf32>
    %8 = arith.truncf %7 : vector<2x128xf32> to vector<2x128xbf16>
    %c0_6 = arith.constant 0 : index
    %c0_7 = arith.constant 0 : index
    %9 = vector.load %arg4[%c0_6, %c0_7] : memref<128x128xbf16, #tpu.memory_space<vmem>>, vector<128x128xbf16>
    %cst_8 = arith.constant dense<0.000000e+00> : vector<2x128xf32>
    %10 = tpu.matmul %8, %9, %cst_8 {dimension_numbers = #tpu.dot_dimension_numbers<[1], [0], [0], [1], [0, 0, 1, 1], [], []>} : vector<2x128xbf16>, vector<128x128xbf16>, vector<2x128xf32> -> vector<2x128xf32>
    %c0_9 = arith.constant 0 : index
    %c0_10 = arith.constant 0 : index
    %11 = vector.load %arg5[%c0_9, %c0_10] : memref<1x128xf32, #tpu.memory_space<vmem>>, vector<1x128xf32>
    %12 = vector.broadcast %11 : vector<1x128xf32> to vector<2x128xf32>
    %13 = arith.addf %10, %12 : vector<2x128xf32>
    %cst_11 = arith.constant 0.000000e+00 : f32
    %14 = vector.broadcast %cst_11 : f32 to vector<2x128xf32>
    %15 = arith.maximumf %13, %14 : vector<2x128xf32>
    %16 = arith.truncf %15 : vector<2x128xf32> to vector<2x128xbf16>
    %c0_12 = arith.constant 0 : index
    %c0_13 = arith.constant 0 : index
    %17 = vector.load %arg6[%c0_12, %c0_13] : memref<128x128xbf16, #tpu.memory_space<vmem>>, vector<128x128xbf16>
    %cst_14 = arith.constant dense<0.000000e+00> : vector<2x128xf32>
    %18 = tpu.matmul %16, %17, %cst_14 {dimension_numbers = #tpu.dot_dimension_numbers<[1], [0], [0], [1], [0, 0, 1, 1], [], []>} : vector<2x128xbf16>, vector<128x128xbf16>, vector<2x128xf32> -> vector<2x128xf32>
    %c0_15 = arith.constant 0 : index
    %c0_16 = arith.constant 0 : index
    %19 = vector.load %arg7[%c0_15, %c0_16] : memref<1x128xf32, #tpu.memory_space<vmem>>, vector<1x128xf32>
    %20 = vector.broadcast %19 : vector<1x128xf32> to vector<2x128xf32>
    %21 = arith.addf %18, %20 : vector<2x128xf32>
    %cst_17 = arith.constant 0.000000e+00 : f32
    %22 = vector.broadcast %cst_17 : f32 to vector<2x128xf32>
    %23 = arith.maximumf %21, %22 : vector<2x128xf32>
    %24 = arith.truncf %23 : vector<2x128xf32> to vector<2x128xbf16>
    %c0_18 = arith.constant 0 : index
    %c0_19 = arith.constant 0 : index
    %25 = vector.load %arg8[%c0_18, %c0_19] : memref<128x256xbf16, #tpu.memory_space<vmem>>, vector<128x256xbf16>
    %cst_20 = arith.constant dense<0.000000e+00> : vector<2x256xf32>
    %26 = tpu.matmul %24, %25, %cst_20 {dimension_numbers = #tpu.dot_dimension_numbers<[1], [0], [0], [1], [0, 0, 1, 1], [], []>} : vector<2x128xbf16>, vector<128x256xbf16>, vector<2x256xf32> -> vector<2x256xf32>
    %c0_21 = arith.constant 0 : index
    %c0_22 = arith.constant 0 : index
    %27 = vector.load %arg9[%c0_21, %c0_22] : memref<1x256xf32, #tpu.memory_space<vmem>>, vector<1x256xf32>
    %28 = vector.broadcast %27 : vector<1x256xf32> to vector<2x256xf32>
    %29 = arith.addf %26, %28 : vector<2x256xf32>
    %cst_23 = arith.constant 0.000000e+00 : f32
    %30 = vector.broadcast %cst_23 : f32 to vector<2x256xf32>
    %31 = arith.maximumf %29, %30 : vector<2x256xf32>
    %c0_24 = arith.constant 0 : index
    %c0_25 = arith.constant 0 : index
    %32 = vector.load %arg10[%c0_24, %c0_25] : memref<2x256xf32, #tpu.memory_space<vmem>>, vector<2x256xf32>
    tpu.vector_store %arg10[%c0_24, %c0_25], %31 {strides = array<i32>} : memref<2x256xf32, #tpu.memory_space<vmem>>, vector<2x256xf32>,
    return
  }
  func.func @transform_0(%arg0: i32) -> (i32, i32) {
    %c0_i32 = arith.constant 0 : i32
    %c0_i32_0 = arith.constant 0 : i32
    return %arg0, %c0_i32 : i32, i32
  }
  func.func @transform_1(%arg0: i32) -> (i32, i32) {
    %c0_i32 = arith.constant 0 : i32
    %c0_i32_0 = arith.constant 0 : i32
    %c0_i32_1 = arith.constant 0 : i32
    return %c0_i32, %c0_i32_0 : i32, i32
  }
  func.func @transform_2(%arg0: i32) -> (i32, i32) {
    %c0_i32 = arith.constant 0 : i32
    %c0_i32_0 = arith.constant 0 : i32
    %c0_i32_1 = arith.constant 0 : i32
    return %c0_i32, %c0_i32_0 : i32, i32
  }
  func.func @transform_3(%arg0: i32) -> (i32, i32) {
    %c0_i32 = arith.constant 0 : i32
    %c0_i32_0 = arith.constant 0 : i32
    %c0_i32_1 = arith.constant 0 : i32
    return %c0_i32, %c0_i32_0 : i32, i32
  }
  func.func @transform_4(%arg0: i32) -> (i32, i32) {
    %c0_i32 = arith.constant 0 : i32
    %c0_i32_0 = arith.constant 0 : i32
    %c0_i32_1 = arith.constant 0 : i32
    return %c0_i32, %c0_i32_0 : i32, i32
  }
  func.func @transform_5(%arg0: i32) -> (i32, i32) {
    %c0_i32 = arith.constant 0 : i32
    %c0_i32_0 = arith.constant 0 : i32
    %c0_i32_1 = arith.constant 0 : i32
    return %c0_i32, %c0_i32_0 : i32, i32
  }
  func.func @transform_6(%arg0: i32) -> (i32, i32) {
    %c0_i32 = arith.constant 0 : i32
    %c0_i32_0 = arith.constant 0 : i32
    %c0_i32_1 = arith.constant 0 : i32
    return %c0_i32, %c0_i32_0 : i32, i32
  }
  func.func @transform_7(%arg0: i32) -> (i32, i32) {
    %c0_i32 = arith.constant 0 : i32
    %c0_i32_0 = arith.constant 0 : i32
    %c0_i32_1 = arith.constant 0 : i32
    return %c0_i32, %c0_i32_0 : i32, i32
  }
  func.func @transform_8(%arg0: i32) -> (i32, i32) {
    %c0_i32 = arith.constant 0 : i32
    %c0_i32_0 = arith.constant 0 : i32
    %c0_i32_1 = arith.constant 0 : i32
    return %c0_i32, %c0_i32_0 : i32, i32
  }
  func.func @transform_9(%arg0: i32) -> (i32, i32) {
    %c0_i32 = arith.constant 0 : i32
    %c0_i32_0 = arith.constant 0 : i32
    return %arg0, %c0_i32 : i32, i32
  }
}

</mosaic_0001>

<bundles_post_ra>
// kernel: tpu_custom_call.1
= control target key start
LH: loop header
LB: loop body
LE: loop exit
PB: predicated region body
PF: predicated region fallthrough
CT: control target
= control target key end

     0   :  { %14 = vsyncpa [#allocation3], 0  ;;  %s1859_s0 = inlined_call_operand.hbm [shape: bf16[2,1024], index: 0, kind: input, shape index: {}]   ;;  %s1860_s1 = inlined_call_operand.hbm [shape: bf16[1024,128], index: 1, kind: input, shape index: {}]   ;;  %s1861_s2 = inlined_call_operand.vmem [shape: f32[1,128], index: 2, kind: input, shape index: {}]   ;;  %s1862_s3 = inlined_call_operand.hbm [shape: bf16[128,128], index: 3, kind: input, shape index: {}]   ;;  %s1863_s4 = inlined_call_operand.hbm [shape: f32[1,128], index: 4, kind: input, shape index: {}]   ;;  %s1864_s5 = inlined_call_operand.hbm [shape: bf16[128,128], index: 5, kind: input, shape index: {}]   ;;  %s1865_s6 = inlined_call_operand.vmem [shape: f32[1,128], index: 6, kind: input, shape index: {}]   ;;  %s1866_s7 = inlined_call_operand.hbm [shape: bf16[128,256], index: 7, kind: input, shape index: {}]   ;;  %s1867_s8 = inlined_call_operand.vmem [shape: f32[1,256], index: 8, kind: input, shape index: {}]   ;;  %s1868_s9 = inlined_call_operand.hbm [shape: f32[2,256], index: 9, kind: output, shape index: {}]  }
   0x1   :  { %15 = vsyncpa [#allocation6], 0 }
   0x2   :  { %16 = vsyncpa [#allocation9], 0 }
   0x3   :  { %17 = vsyncpa [#allocation12], 0  ;;  %s34_s11 = sshll.u32 %s1860_s1, 4  ;;  %s35_s11 = int_to_ptr.hbm [resolvable:$true] %s34_s11 }
   0x4   :  { %18 = vsyncpa [#allocation4], 0  ;;  %s1759_s12 = smov [#allocation5]   ;;  %s63_s16 = sshll.u32 %s1863_s4, 4  ;;  %s64_s16 = int_to_ptr.hbm [resolvable:$true] %s63_s16 }
   0x5   :  { %s36_s13 = sshll.u32 %s1759_s12, 4  ;;  %s1760_s17 = smov 64   ;;  %s37_s13 = int_to_ptr.vmem [resolvable:$true] %s36_s13 }
   0x6   :  { %s1761_s18 = smov 4   ;;  %s1762_s19 = smov [#allocation8]  }
   0x7   :  { %42 = dma.hbm_to_vmem [thread:$0]  %s35_s11, 8192, %s37_s13, [#allocation6], %s1760_s17, %s1760_s17, %s1761_s18  }
   0x8   :  { %s65_s20 = sshll.u32 %s1762_s19, 4  ;;  %s24_s22 = sshll.u32 %s1859_s0, 4  ;;  %s66_s20 = int_to_ptr.vmem [resolvable:$true] %s65_s20  ;;  %s25_s22 = int_to_ptr.hbm [resolvable:$true] %s24_s22 }
   0x9   :  { %68 = dma.hbm_to_vmem [thread:$0]  %s64_s16, 16, %s66_s20, [#allocation9]  }
   0xa   :  { %s49_s4 = sshll.u32 %s1862_s3, 4  ;;  %s1763_s25 = smov [#allocation2]   ;;  %s50_s4 = int_to_ptr.hbm [resolvable:$true] %s49_s4 }
   0xb   :  { %s26_s26 = sshll.u32 %s1763_s25, 4  ;;  %s1764_s27 = smov [#allocation7]   ;;  %s27_s26 = int_to_ptr.vmem [resolvable:$true] %s26_s26 }
   0xc   :  { %29 = dma.hbm_to_vmem [thread:$0]  %s25_s22, 128, %s27_s26, [#allocation3]  }
   0xd   :  { %s51_s28 = sshll.u32 %s1764_s27, 4  ;;  %s73_s10 = sshll.u32 %s1864_s5, 4  ;;  %s52_s28 = int_to_ptr.vmem [resolvable:$true] %s51_s28  ;;  %s74_s10 = int_to_ptr.hbm [resolvable:$true] %s73_s10 }
   0xe   :  { %57 = dma.hbm_to_vmem [thread:$0]  %s50_s4, 1024, %s52_s28, [#allocation6], %s1760_s17, %s1760_s17, %s1761_s18  }
   0xf   :  { %s88_s3 = sshll.u32 %s1866_s7, 4  ;;  %s1765_s12 = smov [#allocation10]   ;;  %s89_s3 = int_to_ptr.hbm [resolvable:$true] %s88_s3 }
  0x10   :  { %s75_s13 = sshll.u32 %s1765_s12, 4  ;;  %s1766_s14 = smov [#allocation11]   ;;  %s76_s13 = int_to_ptr.vmem [resolvable:$true] %s75_s13 }
  0x11   :  { %81 = dma.hbm_to_vmem [thread:$0]  %s74_s10, 1024, %s76_s13, [#allocation9], %s1760_s17, %s1760_s17, %s1761_s18  }
  0x12   :  { %s90_s5 = sshll.u32 %s1766_s14, 4  ;;  %s1767_s15 = smov 128   ;;  %s91_s5 = int_to_ptr.vmem [resolvable:$true] %s90_s5 }
  0x13   :  { %s1768_s16 = smov 8  }
  0x14   :  { %96 = dma.hbm_to_vmem [thread:$0]  %s89_s3, 2048, %s91_s5, [#allocation12], %s1767_s15, %s1767_s15, %s1768_s16  }
  0x15   :  { %1749 = dma.done.wait [#allocation3], 128  }
  0x16   :  { %1750 = vsyncadd [#allocation3], 4294967168 }
  0x17   :  { %1751 = dma.done.wait [#allocation6], 9216  }
  0x18   :  { %1752 = vsyncadd [#allocation6], 4294958080 }
  0x19   :  { %1753 = dma.done.wait [#allocation9], 1040  }
  0x1a   :  { %1754 = vsyncadd [#allocation9], 4294966256 }
  0x1b   :  { %1755 = dma.done.wait [#allocation12], 2048  }
  0x1c   :  { %1756 = vsyncadd [#allocation12], 4294965248  ;;  %v1478_v0 = vld [vmem:[#allocation5 + $0x38] sm:$0xff]  ;;  %v1477_v4 = vld [vmem:[#allocation5 + $0x30] sm:$0xff]  ;;  %s1769_s21 = smov [#allocation13]   ;;  %s1074_s23 = sshll.u32 %s1868_s9, 4  ;;  %s1075_s23 = int_to_ptr.hbm [resolvable:$true] %s1074_s23 }
  0x1d   :  { %v1486_v1 = vld [vmem:[#allocation5 + $0x78] sm:$0xff]  ;;  %658 = vmatpush.bf16.msra.mxu0 %v1478_v0  ;;  %v1485_v5 = vld [vmem:[#allocation5 + $0x70] sm:$0xff]  ;;  %v1476_v8 = vld [vmem:[#allocation5 + $0x28] sm:$0xff]  ;;  %vm1063_vm0 = vcmask 1041408  }
  0x1e   :  { %v1494_v2 = vld [vmem:[#allocation5 + $0xb8] sm:$0xff]  ;;  %671 = vmatpush.bf16.msra.mxu1 %v1486_v1  ;;  %v1493_v6 = vld [vmem:[#allocation5 + $0xb0] sm:$0xff]  ;;  %v1484_v9 = vld [vmem:[#allocation5 + $0x68] sm:$0xff] }
  0x1f   :  { %v1502_v3 = vld [vmem:[#allocation5 + $0xf8] sm:$0xff]  ;;  %684 = vmatpush.bf16.msra.mxu2 %v1494_v2  ;;  %v1501_v7 = vld [vmem:[#allocation5 + $0xf0] sm:$0xff]  ;;  %v1492_v10 = vld [vmem:[#allocation5 + $0xa8] sm:$0xff] }
  0x20   :  { %697 = vmatpush.bf16.msra.mxu3 %v1502_v3  ;;  %v1500_v11 = vld [vmem:[#allocation5 + $0xe8] sm:$0xff]  ;;  %v1475_v12 = vld [vmem:[#allocation5 + $0x20] sm:$0xff]  ;;  %v123_v16 = vld [vmem:[#allocation2] sm:$0xff] }
  0x21   :  { %659 = vmatpush.bf16.msra.mxu0 %v1477_v4  ;;  %v1483_v13 = vld [vmem:[#allocation5 + $0x60] sm:$0xff]  ;;  %v1474_v17 = vld [vmem:[#allocation5 + $0x18] sm:$0xff]  ;;  %257 = vst [vmem:[#allocation1] ss:$9 sm:$0xff] %v123_v16  ;;  %v1473_v21 = vld [vmem:[#allocation5 + $0x10] sm:$0xff] }
  0x22   :  { %672 = vmatpush.bf16.msra.mxu1 %v1485_v5  ;;  %v1491_v14 = vld [vmem:[#allocation5 + $0xa0] sm:$0xff]  ;;  %v1482_v18 = vld [vmem:[#allocation5 + $0x58] sm:$0xff]  ;;  %v1481_v22 = vld [vmem:[#allocation5 + $0x50] sm:$0xff] }
  0x23   :  { %685 = vmatpush.bf16.msra.mxu2 %v1493_v6  ;;  %v1499_v15 = vld [vmem:[#allocation5 + $0xe0] sm:$0xff]  ;;  %v1490_v19 = vld [vmem:[#allocation5 + $0x98] sm:$0xff]  ;;  %v1489_v23 = vld [vmem:[#allocation5 + $0x90] sm:$0xff] }
  0x24   :  { %698 = vmatpush.bf16.msra.mxu3 %v1501_v7  ;;  %v1498_v20 = vld [vmem:[#allocation5 + $0xd8] sm:$0xff]  ;;  %v1497_v24 = vld [vmem:[#allocation5 + $0xd0] sm:$0xff]  ;;  %v1472_v25 = vld [vmem:[#allocation5 + $0x8] sm:$0xff] }
  0x25   :  { %660 = vmatpush.bf16.msra.mxu0 %v1476_v8  ;;  %v1480_v26 = vld [vmem:[#allocation5 + $0x48] sm:$0xff]  ;;  %v1471_v29 = vld [vmem:[#allocation5] sm:$0xff]  ;;  %v1510_v33 = vld [vmem:[#allocation5 + $0x138] sm:$0xff] }
  0x26   :  { %673 = vmatpush.bf16.msra.mxu1 %v1484_v9  ;;  %v1488_v27 = vld [vmem:[#allocation5 + $0x88] sm:$0xff]  ;;  %v1479_v30 = vld [vmem:[#allocation5 + $0x40] sm:$0xff]  ;;  %v1518_v34 = vld [vmem:[#allocation5 + $0x178] sm:$0xff] }
  0x27   :  { %686 = vmatpush.bf16.msra.mxu2 %v1492_v10  ;;  %v1496_v28 = vld [vmem:[#allocation5 + $0xc8] sm:$0xff]  ;;  %v1487_v31 = vld [vmem:[#allocation5 + $0x80] sm:$0xff]  ;;  %v1526_v35 = vld [vmem:[#allocation5 + $0x1b8] sm:$0xff] }
  0x28   :  { %699 = vmatpush.bf16.msra.mxu3 %v1500_v11  ;;  %v1495_v32 = vld [vmem:[#allocation5 + $0xc0] sm:$0xff]  ;;  %v1534_v36 = vld [vmem:[#allocation5 + $0x1f8] sm:$0xff]  ;;  %v1509_v37 = vld [vmem:[#allocation5 + $0x130] sm:$0xff] }
  0x29   :  { %661 = vmatpush.bf16.msra.mxu0 %v1475_v12  ;;  %v260_v38 = vld [vmem:[#allocation1 + $0x12] sm:$0xff]  ;;  %v258_v39 = vld [vmem:[#allocation1] sm:$0xff]  ;;  %v259_v42 = vld [vmem:[#allocation1 + $0x9] sm:$0xff] }
  0x2a   :  { %674 = vmatpush.bf16.msra.mxu1 %v1483_v13  ;;  %v1517_v40 = vld [vmem:[#allocation5 + $0x170] sm:$0xff]  ;;  %v1508_v45 = vld [vmem:[#allocation5 + $0x128] sm:$0xff]  ;;  %v1507_v49 = vld [vmem:[#allocation5 + $0x120] sm:$0xff] }
  0x2b   :  { %687 = vmatpush.bf16.msra.mxu2 %v1491_v14  ;;  %v261_v41 = vld [vmem:[#allocation1 + $0x1b] sm:$0xff]  ;;  %v1515_v50 = vld [vmem:[#allocation5 + $0x160] sm:$0xff]  ;;  %v1506_v53 = vld [vmem:[#allocation5 + $0x118] sm:$0xff] }
  0x2c   :  { %700 = vmatpush.bf16.msra.mxu3 %v1499_v15  ;;  %v1525_v43 = vld [vmem:[#allocation5 + $0x1b0] sm:$0xff]  ;;  %v1516_v46 = vld [vmem:[#allocation5 + $0x168] sm:$0xff]  ;;  %v1523_v51 = vld [vmem:[#allocation5 + $0x1a0] sm:$0xff] }
  0x2d   :  { %662 = vmatpush.bf16.msra.mxu0 %v1474_v17  ;;  %v1533_v44 = vld [vmem:[#allocation5 + $0x1f0] sm:$0xff]  ;;  %v1524_v47 = vld [vmem:[#allocation5 + $0x1a8] sm:$0xff]  ;;  %v1531_v52 = vld [vmem:[#allocation5 + $0x1e0] sm:$0xff] }
  0x2e   :  { %675 = vmatpush.bf16.msra.mxu1 %v1482_v18  ;;  %v1532_v48 = vld [vmem:[#allocation5 + $0x1e8] sm:$0xff]  ;;  %v1514_v54 = vld [vmem:[#allocation5 + $0x158] sm:$0xff]  ;;  %v1505_v57 = vld [vmem:[#allocation5 + $0x110] sm:$0xff] }
  0x2f   :  { %688 = vmatpush.bf16.msra.mxu2 %v1490_v19  ;;  %v1522_v55 = vld [vmem:[#allocation5 + $0x198] sm:$0xff]  ;;  %v1513_v58 = vld [vmem:[#allocation5 + $0x150] sm:$0xff]  ;;  %v1504_v61 = vld [vmem:[#allocation5 + $0x108] sm:$0xff] }
  0x30   :  { %701 = vmatpush.bf16.msra.mxu3 %v1498_v20  ;;  %v1530_v56 = vld [vmem:[#allocation5 + $0x1d8] sm:$0xff]  ;;  %v1521_v59 = vld [vmem:[#allocation5 + $0x190] sm:$0xff]  ;;  %v1512_v62 = vld [vmem:[#allocation5 + $0x148] sm:$0xff] }
  0x31   :  { %663 = vmatpush.bf16.msra.mxu0 %v1473_v21  ;;  %v1529_v60 = vld [vmem:[#allocation5 + $0x1d0] sm:$0xff]  ;;  %v1520_v63 = vld [vmem:[#allocation5 + $0x188] sm:$0xff]  ;;  %v1503_v1 = vld [vmem:[#allocation5 + $0x100] sm:$0xff] }
  0x32   :  { %676 = vmatpush.bf16.msra.mxu1 %v1481_v22  ;;  %v1528_v0 = vld [vmem:[#allocation5 + $0x1c8] sm:$0xff]  ;;  %v1511_v2 = vld [vmem:[#allocation5 + $0x140] sm:$0xff]  ;;  %v262_v5 = vld [vmem:[#allocation1 + $0x24] sm:$0xff] }
  0x33   :  { %689 = vmatpush.bf16.msra.mxu2 %v1489_v23  ;;  %v1519_v3 = vld [vmem:[#allocation5 + $0x180] sm:$0xff]  ;;  %v265_v8 = vld [vmem:[#allocation1 + $0x3f] sm:$0xff]  ;;  %v1542_v9 = vld [vmem:[#allocation7 + $0x38] sm:$0xff] }
  0x34   :  { %702 = vmatpush.bf16.msra.mxu3 %v1497_v24  ;;  %v1527_v4 = vld [vmem:[#allocation5 + $0x1c0] sm:$0xff]  ;;  %v1541_v10 = vld [vmem:[#allocation7 + $0x30] sm:$0xff]  ;;  %v1540_v11 = vld [vmem:[#allocation7 + $0x28] sm:$0xff] }
  0x35   :  { %664 = vmatpush.bf16.msra.mxu0 %v1472_v25  ;;  %v263_v6 = vld [vmem:[#allocation1 + $0x2d] sm:$0xff]  ;;  %v264_v7 = vld [vmem:[#allocation1 + $0x36] sm:$0xff]  ;;  %v1537_v15 = vld [vmem:[#allocation7 + $0x10] sm:$0xff] }
  0x36   :  { %677 = vmatpush.bf16.msra.mxu1 %v1480_v26  ;;  %v1539_v12 = vld [vmem:[#allocation7 + $0x20] sm:$0xff]  ;;  %v1538_v13 = vld [vmem:[#allocation7 + $0x18] sm:$0xff]  ;;  %v1536_v17 = vld [vmem:[#allocation7 + $0x8] sm:$0xff] }
  0x37   :  { %690 = vmatpush.bf16.msra.mxu2 %v1488_v27  ;;  %v1535_v21 = vld [vmem:[#allocation7] sm:$0xff]  ;;  %v1578_v23 = vld [vmem:[%s1861_s2] ss:$0 sm:$0xff]  ;;  %v1549_v27 = vld [vmem:[#allocation10 + $0x30] sm:$0xff] }
  0x38   :  { %703 = vmatpush.bf16.msra.mxu3 %v1496_v28  ;;  %v1550_v24 = vld [vmem:[#allocation10 + $0x38] sm:$0xff] }
  0x39   :  { %665 = vmatpush.bf16.msra.mxu0 %v1471_v29  ;;  %v1548_v29 = vld [vmem:[#allocation10 + $0x28] sm:$0xff] }
  0x3a   :  { %678 = vmatpush.bf16.msra.mxu1 %v1479_v30 }
  0x3b   :  { %691 = vmatpush.bf16.msra.mxu2 %v1487_v31  ;;  %v1547_v31 = vld [vmem:[#allocation10 + $0x20] sm:$0xff] }
  0x3c   :  { %704 = vmatpush.bf16.msra.mxu3 %v1495_v32  ;;  %666 = vmatmul.bf16.vlgmr.msra.gmra.mxu0 %v258_v39 }
  0x3d   :  { %710 = vmatpush.bf16.msrb.mxu0 %v1510_v33  ;;  %679 = vmatmul.bf16.vlgmr.msra.gmra.mxu1 %v259_v42  ;;  %v1546_v33 = vld [vmem:[#allocation10 + $0x18] sm:$0xff] }
  0x3e   :  { %723 = vmatpush.bf16.msrb.mxu1 %v1518_v34  ;;  %692 = vmatmul.bf16.vlgmr.msra.gmra.mxu2 %v260_v38  ;;  %v1545_v38 = vld [vmem:[#allocation10 + $0x10] sm:$0xff] }
  0x3f   :  { %736 = vmatpush.bf16.msrb.mxu2 %v1526_v35  ;;  %705 = vmatmul.bf16.vlgmr.msra.gmra.mxu3 %v261_v41 }
  0x40   :  { %749 = vmatpush.bf16.msrb.mxu3 %v1534_v36 }
  0x41   :  { %711 = vmatpush.bf16.msrb.mxu0 %v1509_v37 }
  0x42   :  { %724 = vmatpush.bf16.msrb.mxu1 %v1517_v40 }
  0x43   :  { %737 = vmatpush.bf16.msrb.mxu2 %v1525_v43 }
  0x44   :  { %750 = vmatpush.bf16.msrb.mxu3 %v1533_v44 }
  0x45   :  { %712 = vmatpush.bf16.msrb.mxu0 %v1508_v45 }
  0x46   :  { %725 = vmatpush.bf16.msrb.mxu1 %v1516_v46 }
  0x47   :  { %738 = vmatpush.bf16.msrb.mxu2 %v1524_v47 }
  0x48   :  { %751 = vmatpush.bf16.msrb.mxu3 %v1532_v48 }
  0x49   :  { %713 = vmatpush.bf16.msrb.mxu0 %v1507_v49 }
  0x4a   :  { %726 = vmatpush.bf16.msrb.mxu1 %v1515_v50  ;;  %v1544_v50 = vld [vmem:[#allocation10 + $0x8] sm:$0xff] }
  0x4b   :  { %739 = vmatpush.bf16.msrb.mxu2 %v1523_v51  ;;  %v1543_v51 = vld [vmem:[#allocation10] sm:$0xff] }
  0x4c   :  { %752 = vmatpush.bf16.msrb.mxu3 %v1531_v52  ;;  %v1465_v52 = vld [vmem:[#allocation11 + $0x70] sm:$0xf] }
  0x4d   :  { %714 = vmatpush.bf16.msrb.mxu0 %v1506_v53  ;;  %v1566_v53 = vld [vmem:[#allocation11 + $0x74] sm:$0xf0] }
  0x4e   :  { %727 = vmatpush.bf16.msrb.mxu1 %v1514_v54  ;;  %v1565_v54 = vld [vmem:[#allocation11 + $0x74] sm:$0xf] }
  0x4f   :  { %740 = vmatpush.bf16.msrb.mxu2 %v1522_v55  ;;  %v1466_v55 = vor.u32 %v1566_v53, %v1465_v52 }
  0x50   :  { %753 = vmatpush.bf16.msrb.mxu3 %v1530_v56  ;;  %v1467_v56 = vld [vmem:[#allocation11 + $0x78] sm:$0xf0] }
  0x51   :  { %715 = vmatpush.bf16.msrb.mxu0 %v1505_v57  ;;  %v1457_v57 = vld [vmem:[#allocation11 + $0x60] sm:$0xf] }
  0x52   :  { %728 = vmatpush.bf16.msrb.mxu1 %v1513_v58  ;;  %v1564_v58 = vld [vmem:[#allocation11 + $0x64] sm:$0xf0] }
  0x53   :  { %741 = vmatpush.bf16.msrb.mxu2 %v1521_v59  ;;  %v1470_v59 = vor.u32 %v1565_v54, %v1467_v56 }
  0x54   :  { %754 = vmatpush.bf16.msrb.mxu3 %v1529_v60  ;;  %v1563_v60 = vld [vmem:[#allocation11 + $0x64] sm:$0xf] }
  0x55   :  { %716 = vmatpush.bf16.msrb.mxu0 %v1504_v61  ;;  %v1459_v61 = vld [vmem:[#allocation11 + $0x68] sm:$0xf0] }
  0x56   :  { %729 = vmatpush.bf16.msrb.mxu1 %v1512_v62  ;;  %v1458_v62 = vor.u32 %v1564_v58, %v1457_v57 }
  0x57   :  { %742 = vmatpush.bf16.msrb.mxu2 %v1520_v63  ;;  %v1462_v63 = vor.u32 %v1563_v60, %v1459_v61 }
  0x58   :  { %755 = vmatpush.bf16.msrb.mxu3 %v1528_v0  ;;  %v1449_v0 = vld [vmem:[#allocation11 + $0x50] sm:$0xf] }
  0x59   :  { %717 = vmatpush.bf16.msrb.mxu0 %v1503_v1  ;;  %v1562_v1 = vld [vmem:[#allocation11 + $0x54] sm:$0xf0] }
  0x5a   :  { %730 = vmatpush.bf16.msrb.mxu1 %v1511_v2  ;;  %v1561_v2 = vld [vmem:[#allocation11 + $0x54] sm:$0xf] }
  0x5b   :  { %743 = vmatpush.bf16.msrb.mxu2 %v1519_v3  ;;  %v1451_v3 = vld [vmem:[#allocation11 + $0x58] sm:$0xf0] }
  0x5c   :  { %756 = vmatpush.bf16.msrb.mxu3 %v1527_v4  ;;  %718 = vmatmul.bf16.vlgmr.msrb.gmra.mxu0 %v262_v5  ;;  %v1450_v4 = vor.u32 %v1562_v1, %v1449_v0  ;;  %v1454_v5 = vor.u32 %v1561_v2, %v1451_v3 }
  0x5d   :  { %731 = vmatmul.bf16.vlgmr.msrb.gmra.mxu1 %v263_v6  ;;  %832 = vmatpush.bf16.msra.mxu0 %v1542_v9  ;;  %v1441_v6 = vld [vmem:[#allocation11 + $0x40] sm:$0xf]  ;;  %v1443_v9 = vld [vmem:[#allocation11 + $0x48] sm:$0xf0] }
  0x5e   :  { %744 = vmatmul.bf16.vlgmr.msrb.gmra.mxu2 %v264_v7  ;;  %915 = vmatpush.bf16.msra.mxu1 %v1550_v24  ;;  %v1560_v7 = vld [vmem:[#allocation11 + $0x44] sm:$0xf0]  ;;  %v1579_v24 = vld [vmem:[#allocation8] ss:$0 sm:$0xff] }
  0x5f   :  { %757 = vmatmul.bf16.vlgmr.msrb.gmra.mxu3 %v265_v8  ;;  %1032 = vmatpush.bf16.msra.mxu2 %v1466_v55  ;;  %v1559_v8 = vld [vmem:[#allocation11 + $0x44] sm:$0xf] }
  0x60   :  { %1045 = vmatpush.bf16.msra.mxu3 %v1470_v59 }
  0x61   :  { %833 = vmatpush.bf16.msra.mxu0 %v1541_v10  ;;  %v1442_v10 = vor.u32 %v1560_v7, %v1441_v6 }
  0x62   :  { %916 = vmatpush.bf16.msra.mxu1 %v1549_v27 }
  0x63   :  { %1033 = vmatpush.bf16.msra.mxu2 %v1458_v62 }
  0x64   :  { %1046 = vmatpush.bf16.msra.mxu3 %v1462_v63 }
  0x65   :  { %834 = vmatpush.bf16.msra.mxu0 %v1540_v11  ;;  %v1446_v11 = vor.u32 %v1559_v8, %v1443_v9 }
  0x66   :  { %917 = vmatpush.bf16.msra.mxu1 %v1548_v29 }
  0x67   :  { %1034 = vmatpush.bf16.msra.mxu2 %v1450_v4 }
  0x68   :  { %1047 = vmatpush.bf16.msra.mxu3 %v1454_v5 }
  0x69   :  { %835 = vmatpush.bf16.msra.mxu0 %v1539_v12  ;;  %v1433_v12 = vld [vmem:[#allocation11 + $0x30] sm:$0xf] }
  0x6a   :  { %918 = vmatpush.bf16.msra.mxu1 %v1547_v31  ;;  %v1554_v31 = vld [vmem:[#allocation11 + $0x14] sm:$0xf0] }
  0x6b   :  { %1035 = vmatpush.bf16.msra.mxu2 %v1442_v10 }
  0x6c   :  { %1048 = vmatpush.bf16.msra.mxu3 %v1446_v11 }
  0x6d   :  { %836 = vmatpush.bf16.msra.mxu0 %v1538_v13  ;;  %v1558_v13 = vld [vmem:[#allocation11 + $0x34] sm:$0xf0] }
  0x6e   :  { %919 = vmatpush.bf16.msra.mxu1 %v1546_v33 }
  0x71   :  { %837 = vmatpush.bf16.msra.mxu0 %v1537_v15  ;;  %v1435_v15 = vld [vmem:[#allocation11 + $0x38] sm:$0xf0] }
  0x72   :  { %920 = vmatpush.bf16.msra.mxu1 %v1545_v38  ;;  %v1551_v38 = vld [vmem:[#allocation11 + $0x4] sm:$0xf] }
  0x75   :  { %838 = vmatpush.bf16.msra.mxu0 %v1536_v17 }
  0x76   :  { %921 = vmatpush.bf16.msra.mxu1 %v1544_v50 }
  0x79   :  { %839 = vmatpush.bf16.msra.mxu0 %v1535_v21  ;;  %v1427_v21 = vld [vmem:[#allocation11 + $0x28] sm:$0xf0] }
  0x7a   :  { %922 = vmatpush.bf16.msra.mxu1 %v1543_v51 }
  0xb9   :  { %v667_v14 = vpop.f32.mrf.mxu0 }
  0xba   :  { %v680_v16 = vpop.f32.mrf.mxu1  ;;  %v668_v28 = vadd.f32 %v1578_v23, %v667_v14  ;;  %v1557_v14 = vld [vmem:[#allocation11 + $0x34] sm:$0xf] }
  0xbb   :  { %v1438_v17 = vor.u32 %v1557_v14, %v1435_v15 }
  0xbc   :  { %v681_v30 = vadd.f32 %v680_v16, %v668_v28  ;;  %v1434_v16 = vor.u32 %v1558_v13, %v1433_v12 }
  0xbd   :  { %1049 = vmatpush.bf16.msra.mxu3 %v1438_v17 }
  0xbe   :  { %1036 = vmatpush.bf16.msra.mxu2 %v1434_v16 }
  0xc1   :  { %v693_v18 = vpop.f32.mrf.mxu2  ;;  %v669_v20 = vpop.f32.mrf.mxu0 }
  0xc2   :  { %v706_v19 = vpop.f32.mrf.mxu3  ;;  %v682_v22 = vpop.f32.mrf.mxu1  ;;  %v694_v32 = vadd.f32 %v693_v18, %v681_v30  ;;  %v1425_v18 = vld [vmem:[#allocation11 + $0x20] sm:$0xf]  ;;  %v1555_v20 = vld [vmem:[#allocation11 + $0x24] sm:$0xf]  ;;  %v1417_v30 = vld [vmem:[#allocation11 + $0x10] sm:$0xf] }
  0xc3   :  { %v1430_v23 = vor.u32 %v1555_v20, %v1427_v21  ;;  %v1418_v33 = vor.u32 %v1554_v31, %v1417_v30 }
  0xc4   :  { %v707_v34 = vadd.f32 %v706_v19, %v694_v32  ;;  %v1556_v19 = vld [vmem:[#allocation11 + $0x24] sm:$0xf0]  ;;  %v1553_v32 = vld [vmem:[#allocation11 + $0x14] sm:$0xf] }
  0xc5   :  { %v1426_v22 = vor.u32 %v1556_v19, %v1425_v18  ;;  %1050 = vmatpush.bf16.msra.mxu3 %v1430_v23 }
  0xc7   :  { %1037 = vmatpush.bf16.msra.mxu2 %v1426_v22 }
  0xc9   :  { %v695_v25 = vpop.f32.mrf.mxu2 }
  0xca   :  { %v708_v26 = vpop.f32.mrf.mxu3 }
  0xcb   :  { %1038 = vmatpush.bf16.msra.mxu2 %v1418_v33 }
  0xd9   :  { %v719_v35 = vpop.f32.mrf.mxu0 }
  0xda   :  { %v732_v36 = vpop.f32.mrf.mxu1  ;;  %v720_v37 = vadd.f32 %v719_v35, %v707_v34  ;;  %v1419_v34 = vld [vmem:[#allocation11 + $0x18] sm:$0xf0] }
  0xdb   :  { %v1422_v35 = vor.u32 %v1553_v32, %v1419_v34 }
  0xdc   :  { %v733_v39 = vadd.f32 %v732_v36, %v720_v37  ;;  %v1409_v36 = vld [vmem:[#allocation11] sm:$0xf]  ;;  %v1552_v37 = vld [vmem:[#allocation11 + $0x4] sm:$0xf0] }
  0xdd   :  { %1051 = vmatpush.bf16.msra.mxu3 %v1422_v35 }
  0xe1   :  { %v745_v40 = vpop.f32.mrf.mxu2  ;;  %v721_v43 = vpop.f32.mrf.mxu0 }
  0xe2   :  { %v758_v41 = vpop.f32.mrf.mxu3  ;;  %v746_v42 = vadd.f32 %v745_v40, %v733_v39  ;;  %v734_v44 = vpop.f32.mrf.mxu1  ;;  %v1410_v39 = vor.u32 %v1552_v37, %v1409_v36  ;;  %v1411_v40 = vld [vmem:[#allocation11 + $0x8] sm:$0xf0] }
  0xe4   :  { %v759_v45 = vadd.f32 %v758_v41, %v746_v42  ;;  %v1414_v41 = vor.u32 %v1551_v38, %v1411_v40  ;;  %1039 = vmatpush.bf16.msra.mxu2 %v1410_v39  ;;  %v1580_v42 = vld [vmem:[%s1865_s6] ss:$0 sm:$0xff]  ;;  %s1072_s6 = sshll.u32 %s1769_s21, 4  ;;  %s1073_s6 = int_to_ptr.vmem [resolvable:$true] %s1072_s6 }
  0xe6   :  { %v762_v46 = vmax.f32 %v759_v45, 0.0  ;;  %1052 = vmatpush.bf16.msra.mxu3 %v1414_v41 }
  0xe8   :  { %v763_v47 = vpack.c.bf16 %v762_v46, %v762_v46 }
  0xe9   :  { %v747_v48 = vpop.f32.mrf.mxu2 }
  0xea   :  { %v760_v49 = vpop.f32.mrf.mxu3  ;;  %840 = vmatmul.bf16.vlgmr.msra.gmra.mxu0 %v763_v47  ;;  %v946_v48 = vld [vmem:[%s1867_s8] sm:$0x3] }
  0xeb   :  { %v948_v49 = vperm.slane %v946_v48, 0  ;;  %v949_v50 = vperm.slane %v946_v48, 1 }
 0x167   :  { %v841_v25 = vpop.f32.mrf.mxu0 }
 0x168   :  { %v842_v26 = vadd.f32 %v1579_v24, %v841_v25 }
 0x16a   :  { %v845_v27 = vmax.f32 %v842_v26, 0.0 }
 0x16c   :  { %v846_v28 = vpack.c.bf16 %v845_v27, %v845_v27 }
 0x16e   :  { %923 = vmatmul.bf16.vlgmr.msra.gmra.mxu1 %v846_v28 }
 0x16f   :  { %v843_v29 = vpop.f32.mrf.mxu0 }
 0x1eb   :  { %v924_v43 = vpop.f32.mrf.mxu1 }
 0x1ec   :  { %v925_v44 = vadd.f32 %v1580_v42, %v924_v43 }
 0x1ee   :  { %v928_v45 = vmax.f32 %v925_v44, 0.0 }
 0x1f0   :  { %v929_v46 = vpack.c.bf16 %v928_v45, %v928_v45 }
 0x1f2   :  { %1040 = vmatmul.bf16.vlgmr.msra.gmra.mxu2 %v929_v46  ;;  %1053 = vmatmul.bf16.vlgmr.msra.gmra.mxu3 %v929_v46 }
 0x1f3   :  { %v926_v47 = vpop.f32.mrf.mxu1 }
 0x275   :  { %v1041_v51 = vpop.f32.mrf.mxu2  ;;  %v1054_v52 = vpop.f32.mrf.mxu3 }
 0x276   :  { %v1042_v53 = vadd.f32 %v1041_v51, %v948_v49  ;;  %v1055_v54 = vadd.f32 %v1054_v52, %v949_v50 }
 0x278   :  { %v1059_v55 = vmax.f32 %v1055_v54, 0.0  ;;  %v1058_v56 = vmax.f32 %v1042_v53, 0.0 }
 0x27a   :  { %v1062_v57 = vrot.slane %v1059_v55, 6 }
 0x27c   :  { %v1064_v58 = vsel %vm1063_vm0, %v1058_v56, %v1062_v57 }
 0x27d   :  { %v1043_v59 = vpop.f32.mrf.mxu2  ;;  %v1056_v60 = vpop.f32.mrf.mxu3  ;;  %1066 = vst [vmem:[#allocation13] sm:$0xf] %v1064_v58 }
 0x27e   :  { %1077 = dma.vmem_to_hbm [thread:$0]  %s1073_s6, 64, %s1075_s23, [#allocation4]  }
 0x27f   :  { %1757 = dma.done.wait [#allocation4], 64  }
 0x280   :  { %1758 = vsyncadd [#allocation4], 4294967232 }
 0x281   :  { %1082 = vsyncpa [#allocation3], 1 }
 0x282   :  { %1083 = vsyncpa [#allocation6], 1 }
 0x283   :  { %1084 = vsyncpa [#allocation9], 1 }
 0x284   :  { %1085 = vsyncpa [#allocation12], 1 }
 0x285   :  { %1086 = vsyncpa [#allocation4], 1 }

</bundles_post_ra>
